<compile_context>
chip_gen: v7x
topology: tpu7x:2x2x1
jax: 0.10.0
libtpu: 0.0.40
codegen_flags: <defaults>
</compile_context>

<pallas_src>
import functools

import jax
import jax.numpy as jnp
from jax.experimental import pallas as pl
from jax.experimental.pallas import tpu as pltpu


def _choose_row_tile(n):
    # Largest (8,128)-friendly row tile <= 512 that does not exceed n too much.
    for t in (512, 256, 128, 64, 32, 16, 8):
        if n >= t:
            return t
    return 8


def _lnpmil_kernel(norm_p_ref, x_ref, w_ref, b_ref,
                   yprobs_ref, yprob_ref, acc_ref,
                   *, n_rows, n_cols, tile_n):
    i = pl.program_id(0)

    @pl.when(i == 0)
    def _():
        acc_ref[...] = jnp.zeros_like(acc_ref)

    # (TN, D) @ (D, O_pad) -> (TN, O_pad), lane-dense output of one MXU matmul.
    x = x_ref[...].astype(jnp.float32)
    logits = jnp.dot(x, w_ref[...],
                     preferred_element_type=jnp.float32) + b_ref[...]
    y_probs = jnp.abs(logits)                                   # (TN, O_pad)
    yprobs_ref[...] = y_probs.astype(yprobs_ref.dtype)          # lane-dense store

    # Lp accumulation: mask padded rows (>= n_rows) and padded cols (>= n_cols).
    p = norm_p_ref[0, 0]
    rows = jax.lax.broadcasted_iota(jnp.int32, y_probs.shape, 0) + i * tile_n
    cols = jax.lax.broadcasted_iota(jnp.int32, y_probs.shape, 1)
    valid = (rows < n_rows) & (cols < n_cols)
    # y_probs ** p via exp/log (EUP); 0 ** p handled by the where.
    powed = jnp.where(valid & (y_probs > 0.0),
                      jnp.exp(p * jnp.log(jnp.maximum(y_probs, 1e-30))),
                      0.0)
    acc_ref[...] += jnp.sum(powed, axis=0, keepdims=True)       # (1, O_pad)

    @pl.when(i == pl.num_programs(0) - 1)
    def _():
        total = jnp.sum(acc_ref[...], axis=1, keepdims=True)    # (1, 1)
        mean = total * (1.0 / float(n_rows * n_cols))
        yprob_ref[...] = jnp.where(mean > 0.0,
                                   jnp.exp(jnp.log(jnp.maximum(mean, 1e-30)) / p),
                                   0.0)


def lnpmil_forward(x, weight, bias, p):
    """x: (N, D); weight: (O, D) PyTorch-style; bias: (O,); p: scalar param.

    Returns (Y_prob scalar, Y_probs of shape (N, O))."""
    N, D = x.shape
    O = weight.shape[0]

    TN = _choose_row_tile(N)
    N_pad = pl.cdiv(N, TN) * TN
    O_pad = pl.cdiv(O, 128) * 128

    # Pad rows of x with zeros; pad weight/bias output columns with zeros.
    x_p = x if N_pad == N else jnp.pad(x, ((0, N_pad - N), (0, 0)))
    w_t = jnp.zeros((D, O_pad), jnp.float32).at[:, :O].set(
        weight.T.astype(jnp.float32))
    b_p = jnp.zeros((1, O_pad), jnp.float32).at[0, :O].set(
        bias.astype(jnp.float32))
    norm_p = (1.0 + jnp.log1p(jnp.exp(p))).reshape(1, 1).astype(jnp.float32)

    grid = (N_pad // TN,)
    kernel = functools.partial(_lnpmil_kernel, n_rows=N, n_cols=O, tile_n=TN)

    yprobs_pad, yprob = pl.pallas_call(
        kernel,
        out_shape=(
            jax.ShapeDtypeStruct((N_pad, O_pad), x.dtype),   # Y_probs (padded)
            jax.ShapeDtypeStruct((1, 1), jnp.float32),       # Y_prob
        ),
        grid_spec=pltpu.PrefetchScalarGridSpec(
            num_scalar_prefetch=0,
            grid=grid,
            in_specs=[
                pl.BlockSpec(memory_space=pltpu.MemorySpace.SMEM),   # norm_p
                pl.BlockSpec((TN, D), lambda i: (i, 0)),             # x tile
                pl.BlockSpec((D, O_pad), lambda i: (0, 0)),          # weight
                pl.BlockSpec((1, O_pad), lambda i: (0, 0)),          # bias
            ],
            out_specs=(
                pl.BlockSpec((TN, O_pad), lambda i: (i, 0)),         # Y_probs
                pl.BlockSpec((1, 1), lambda i: (0, 0)),              # Y_prob
            ),
            scratch_shapes=[pltpu.VMEM((1, O_pad), jnp.float32)],
        ),
        compiler_params=pltpu.CompilerParams(
            dimension_semantics=("arbitrary",),          # reduction over N tiles
            vmem_limit_bytes=32 * 1024 * 1024,
        ),
    )(norm_p, x_p, w_t, b_p)

    # TODO(synk): if multiple independent bags are processed at once, add a
    # leading "parallel" bag grid axis to shard across v7x's 2 TensorCores.
    return yprob[0, 0], yprobs_pad[:N, :O]


def lnpmil_reference(x, weight, bias, p):
    y_probs = jnp.abs(x @ weight.T + bias)
    norm_p = 1.0 + jnp.log(1.0 + jnp.exp(p))
    y_prob = jnp.mean(y_probs ** norm_p) ** (1.0 / norm_p)
    return y_prob, y_probs


if __name__ == "__main__":
    N, D, O = 20, 32, 1          # 20 instances, input_size=32, output_size=1

    key = jax.random.PRNGKey(0)
    kx, kw, kb = jax.random.split(key, 3)

    x = jax.random.normal(kx, (N, D), dtype=jnp.float32)
    bound = 1.0 / (D ** 0.5)
    weight = jax.random.uniform(kw, (O, D), jnp.float32, -bound, bound)
    bias = jax.random.uniform(kb, (O,), jnp.float32, -bound, bound)
    p = jnp.float32(1.0)         # norm parameter init (norm=1.0)

    y_prob, y_probs = lnpmil_forward(x, weight, bias, p)
    jax.block_until_ready((y_prob, y_probs))

    y_ref, yp_ref = lnpmil_reference(x, weight, bias, p)
    assert jnp.allclose(y_prob, y_ref, atol=1e-3, rtol=1e-3), (y_prob, y_ref)
    assert jnp.allclose(y_probs, yp_ref, atol=1e-3, rtol=1e-3)

    print("KERNEL_OK")
</pallas_src>

<mosaic_0001>
module attributes {stable_mosaic.version = 11 : i64} {
  func.func @_lnpmil_kernel(%arg0: i32, %arg1: memref<1x1xf32, #tpu.memory_space<smem>>, %arg2: memref<16x32xf32, #tpu.memory_space<vmem>>, %arg3: memref<32x128xf32, #tpu.memory_space<vmem>>, %arg4: memref<1x128xf32, #tpu.memory_space<vmem>>, %arg5: memref<16x128xf32, #tpu.memory_space<vmem>>, %arg6: memref<1x1xf32, #tpu.memory_space<vmem>>, %arg7: memref<1x128xf32, #tpu.memory_space<vmem>>) attributes {dimension_semantics = [#tpu.dimension_semantics<arbitrary>], iteration_bounds = array<i64: 2>, scalar_prefetch = 0 : i64, scratch_operands = 1 : i64, tpu.core_type = #tpu.core_type<tc>, window_params = [{transform_indices = @transform_0, window_bounds = array<i64: 1, 1>}, {transform_indices = @transform_1, window_bounds = array<i64: 16, 32>}, {pipeline_mode = #tpu.pipeline_mode<synchronous>, transform_indices = @transform_2, window_bounds = array<i64: 32, 128>}, {pipeline_mode = #tpu.pipeline_mode<synchronous>, transform_indices = @transform_3, window_bounds = array<i64: 1, 128>}, {transform_indices = @transform_4, window_bounds = array<i64: 16, 128>}, {pipeline_mode = #tpu.pipeline_mode<synchronous>, transform_indices = @transform_5, window_bounds = array<i64: 1, 1>}]} {
    %c0_i32 = arith.constant 0 : i32
    %0 = arith.cmpi eq, %arg0, %c0_i32 : i32
    %1 = arith.extui %0 : i1 to i32
    %c0_i32_0 = arith.constant 0 : i32
    %2 = arith.cmpi ne, %1, %c0_i32_0 : i32
    scf.if %2 {
      %cst_20 = arith.constant 0.000000e+00 : f32
      %41 = vector.broadcast %cst_20 : f32 to vector<1x128xf32>
      %c0_21 = arith.constant 0 : index
      %c0_22 = arith.constant 0 : index
      %42 = vector.load %arg7[%c0_21, %c0_22] : memref<1x128xf32, #tpu.memory_space<vmem>>, vector<1x128xf32>
      tpu.vector_store %arg7[%c0_21, %c0_22], %41 {strides = array<i32>} : memref<1x128xf32, #tpu.memory_space<vmem>>, vector<1x128xf32>,
    } else {
    }
    %c0 = arith.constant 0 : index
    %c0_1 = arith.constant 0 : index
    %3 = vector.load %arg2[%c0, %c0_1] : memref<16x32xf32, #tpu.memory_space<vmem>>, vector<16x32xf32>
    %c0_2 = arith.constant 0 : index
    %c0_3 = arith.constant 0 : index
    %4 = vector.load %arg3[%c0_2, %c0_3] : memref<32x128xf32, #tpu.memory_space<vmem>>, vector<32x128xf32>
    %cst = arith.constant dense<0.000000e+00> : vector<16x128xf32>
    %5 = tpu.matmul %3, %4, %cst {dimension_numbers = #tpu.dot_dimension_numbers<[1], [0], [0], [1], [0, 0, 1, 1], [], []>} : vector<16x32xf32>, vector<32x128xf32>, vector<16x128xf32> -> vector<16x128xf32>
    %c0_4 = arith.constant 0 : index
    %c0_5 = arith.constant 0 : index
    %6 = vector.load %arg4[%c0_4, %c0_5] : memref<1x128xf32, #tpu.memory_space<vmem>>, vector<1x128xf32>
    %7 = vector.broadcast %6 : vector<1x128xf32> to vector<16x128xf32>
    %8 = arith.addf %5, %7 : vector<16x128xf32>
    %9 = math.absf %8 : vector<16x128xf32>
    %c0_6 = arith.constant 0 : index
    %c0_7 = arith.constant 0 : index
    %10 = vector.load %arg5[%c0_6, %c0_7] : memref<16x128xf32, #tpu.memory_space<vmem>>, vector<16x128xf32>
    tpu.vector_store %arg5[%c0_6, %c0_7], %9 {strides = array<i32>} : memref<16x128xf32, #tpu.memory_space<vmem>>, vector<16x128xf32>,
    %c0_8 = arith.constant 0 : index
    %c0_9 = arith.constant 0 : index
    %11 = memref.load %arg1[%c0_8, %c0_9] : memref<1x1xf32, #tpu.memory_space<smem>>
    %12 = tpu.iota {dimensions = array<i32: 0>} : vector<16x128xi32>
    %c16_i32 = arith.constant 16 : i32
    %13 = arith.muli %arg0, %c16_i32 : i32
    %14 = vector.broadcast %13 : i32 to vector<16x128xi32>
    %15 = arith.addi %12, %14 : vector<16x128xi32>
    %16 = tpu.iota {dimensions = array<i32: 1>} : vector<16x128xi32>
    %c20_i32 = arith.constant 20 : i32
    %17 = vector.broadcast %c20_i32 : i32 to vector<16x128xi32>
    %18 = arith.cmpi slt, %15, %17 : vector<16x128xi32>
    %c1_i32 = arith.constant 1 : i32
    %19 = vector.broadcast %c1_i32 : i32 to vector<16x128xi32>
    %20 = arith.cmpi slt, %16, %19 : vector<16x128xi32>
    %21 = arith.andi %18, %20 : vector<16x128xi1>
    %cst_10 = arith.constant 0.000000e+00 : f32
    %22 = vector.broadcast %cst_10 : f32 to vector<16x128xf32>
    %23 = arith.cmpf ogt, %9, %22 : vector<16x128xf32>
    %24 = arith.andi %21, %23 : vector<16x128xi1>
    %cst_11 = arith.constant 1.000000e-30 : f32
    %25 = vector.broadcast %cst_11 : f32 to vector<16x128xf32>
    %26 = arith.maximumf %9, %25 : vector<16x128xf32>
    %27 = math.log %26 : vector<16x128xf32>
    %28 = vector.broadcast %11 : f32 to vector<16x128xf32>
    %29 = arith.mulf %28, %27 : vector<16x128xf32>
    %30 = math.exp %29 : vector<16x128xf32>
    %cst_12 = arith.constant 0.000000e+00 : f32
    %31 = vector.broadcast %cst_12 : f32 to vector<16x128xf32>
    %32 = arith.select %24, %30, %31 : vector<16x128xi1>, vector<16x128xf32>
    %c0_13 = arith.constant 0 : index
    %c0_14 = arith.constant 0 : index
    %33 = vector.load %arg7[%c0_13, %c0_14] : memref<1x128xf32, #tpu.memory_space<vmem>>, vector<1x128xf32>
    %cst_15 = arith.constant dense<0.000000e+00> : vector<128xf32>
    %34 = vector.multi_reduction <add>, %32, %cst_15 [0] : vector<16x128xf32> to vector<128xf32>
    %35 = vector.shape_cast %34 : vector<128xf32> to vector<1x128xf32>
    %36 = arith.addf %33, %35 : vector<1x128xf32>
    %c0_16 = arith.constant 0 : index
    %c0_17 = arith.constant 0 : index
    %37 = vector.load %arg7[%c0_16, %c0_17] : memref<1x128xf32, #tpu.memory_space<vmem>>, vector<1x128xf32>
    tpu.vector_store %arg7[%c0_16, %c0_17], %36 {strides = array<i32>} : memref<1x128xf32, #tpu.memory_space<vmem>>, vector<1x128xf32>,
    %c1_i32_18 = arith.constant 1 : i32
    %38 = arith.cmpi eq, %arg0, %c1_i32_18 : i32
    %39 = arith.extui %38 : i1 to i32
    %c0_i32_19 = arith.constant 0 : i32
    %40 = arith.cmpi ne, %39, %c0_i32_19 : i32
    scf.if %40 {
      %c0_20 = arith.constant 0 : index
      %c0_21 = arith.constant 0 : index
      %41 = vector.load %arg7[%c0_20, %c0_21] : memref<1x128xf32, #tpu.memory_space<vmem>>, vector<1x128xf32>
      %cst_22 = arith.constant dense<0.000000e+00> : vector<1xf32>
      %42 = vector.multi_reduction <add>, %41, %cst_22 [1] : vector<1x128xf32> to vector<1xf32>
      %43 = vector.shape_cast %42 : vector<1xf32> to vector<1x1xf32>
      %cst_23 = arith.constant 5.000000e-02 : f32
      %44 = vector.broadcast %cst_23 : f32 to vector<1x1xf32>
      %45 = arith.mulf %43, %44 : vector<1x1xf32>
      %cst_24 = arith.constant 0.000000e+00 : f32
      %46 = vector.broadcast %cst_24 : f32 to vector<1x1xf32>
      %47 = arith.cmpf ogt, %45, %46 : vector<1x1xf32>
      %cst_25 = arith.constant 1.000000e-30 : f32
      %48 = vector.broadcast %cst_25 : f32 to vector<1x1xf32>
      %49 = arith.maximumf %45, %48 : vector<1x1xf32>
      %50 = math.log %49 : vector<1x1xf32>
      %51 = vector.broadcast %11 : f32 to vector<1x1xf32>
      %52 = arith.divf %50, %51 : vector<1x1xf32>
      %53 = math.exp %52 : vector<1x1xf32>
      %cst_26 = arith.constant 0.000000e+00 : f32
      %54 = vector.broadcast %cst_26 : f32 to vector<1x1xf32>
      %55 = arith.select %47, %53, %54 : vector<1x1xi1>, vector<1x1xf32>
      %c0_27 = arith.constant 0 : index
      %c0_28 = arith.constant 0 : index
      %56 = vector.load %arg6[%c0_27, %c0_28] : memref<1x1xf32, #tpu.memory_space<vmem>>, vector<1x1xf32>
      tpu.vector_store %arg6[%c0_27, %c0_28], %55 {strides = array<i32>} : memref<1x1xf32, #tpu.memory_space<vmem>>, vector<1x1xf32>,
    } else {
    }
    return
  }
  func.func @transform_0(%arg0: i32) -> (i32, i32) {
    %c0_i32 = arith.constant 0 : i32
    %c0_i32_0 = arith.constant 0 : i32
    %c0_i32_1 = arith.constant 0 : i32
    return %c0_i32, %c0_i32_0 : i32, i32
  }
  func.func @transform_1(%arg0: i32) -> (i32, i32) {
    %c0_i32 = arith.constant 0 : i32
    %c0_i32_0 = arith.constant 0 : i32
    return %arg0, %c0_i32 : i32, i32
  }
  func.func @transform_2(%arg0: i32) -> (i32, i32) {
    %c0_i32 = arith.constant 0 : i32
    %c0_i32_0 = arith.constant 0 : i32
    %c0_i32_1 = arith.constant 0 : i32
    return %c0_i32, %c0_i32_0 : i32, i32
  }
  func.func @transform_3(%arg0: i32) -> (i32, i32) {
    %c0_i32 = arith.constant 0 : i32
    %c0_i32_0 = arith.constant 0 : i32
    %c0_i32_1 = arith.constant 0 : i32
    return %c0_i32, %c0_i32_0 : i32, i32
  }
  func.func @transform_4(%arg0: i32) -> (i32, i32) {
    %c0_i32 = arith.constant 0 : i32
    %c0_i32_0 = arith.constant 0 : i32
    return %arg0, %c0_i32 : i32, i32
  }
  func.func @transform_5(%arg0: i32) -> (i32, i32) {
    %c0_i32 = arith.constant 0 : i32
    %c0_i32_0 = arith.constant 0 : i32
    %c0_i32_1 = arith.constant 0 : i32
    return %c0_i32, %c0_i32_0 : i32, i32
  }
}

</mosaic_0001>

<bundles_post_ra>
// kernel: tpu_custom_call.1
= control target key start
LH: loop header
LB: loop body
LE: loop exit
PB: predicated region body
PF: predicated region fallthrough
CT: control target
= control target key end

     0   :  { %s1126_s0 = inlined_call_operand.<no memory space> [shape: f32[1,1], index: 0, kind: input, shape index: {}]   ;;  %s1127_s1 = inlined_call_operand.hbm [shape: f32[32,32], index: 1, kind: input, shape index: {}]   ;;  %s1128_s2 = inlined_call_operand.hbm [shape: f32[32,128], index: 2, kind: input, shape index: {}]   ;;  %s1129_s3 = inlined_call_operand.vmem [shape: f32[1,128], index: 3, kind: input, shape index: {}]   ;;  %s1130_s4 = inlined_call_operand.hbm [shape: f32[32,128], index: 4, kind: output, shape index: {0}]   ;;  %s1131_s5 = inlined_call_operand.hbm [shape: f32[1,1], index: 5, kind: output, shape index: {1}]  }
   0x1   :  { %11 = sst [smem:[#allocation3]] %s1126_s0 }
   0x2   :  { %12 = vsyncpa [#allocation5], 0 }
   0x3   :  { %14 = vsyncpa [#allocation5 + $0x1], 0 }
   0x4   :  { %15 = vsyncpa [#allocation8], 0 }
   0x5   :  { %16 = vsyncpa [#allocation6], 0 }
   0x6   :  { %18 = vsyncpa [#allocation6 + $0x1], 0 }
   0x7   :  { %19 = vsyncpa [#allocation11], 0  ;;  %s884_s20 = smov 0   ;;  %s886_s21 = smov 0  }
   0x8   :  { %s888_s22 = smov 0   ;;  %s890_s23 = smov 0  }
   0x9 LB: > { %s905_s0 = sadd.s32 4294967295, %s840_s23   ;;  %s548_s24 = sadd.s32 4294967294, %s840_s23   ;;  %s840_s23 = sphi %s890_s23, %s1157_s23   ;;  %s836_s22 = sphi %s888_s22, %s1156_s22   ;;  %s832_s21 = sphi %s886_s21, %s1155_s21   ;;  %s828_s20 = sphi %s884_s20, %s1154_s20  }
   0xa   : > { %p66_p0 = scmp.ne.s32.totalorder %s832_s21, %s828_s20  ;;  %p1132_p1 = scmp.eq.s32.totalorder %s905_s0, 0 }
   0xb   : > { %p138_p3 = scmp.eq.s32.totalorder %s548_s24, 1  ;;  %p549_p5 = scmp.ge.s32.totalorder %s840_s23, 1 }
   0xc   : > { %p914_p4 = por %p1132_p1, %p66_p0  ;;  %p166_p7 = scmp.lt.s32.totalorder %s840_s23, 3 }
   0xd   : > { %p919_p6 = por %p138_p3, %p66_p0  ;;  %s842_s28 = smov [#allocation7]  }
   0xe   : > { %s1135_s25 = scalar_select %p914_p4, 1, 0 }
   0xf   : > { %s1136_s26 = scalar_select %p919_p6, 1, 0 }
  0x10   : > { %p925_p9 = pnand %p549_p5, %p166_p7  ;;  %s181_s29 = sshll.u32 %s842_s28, 4  ;;  %s929_s29 = int_to_ptr.vmem [resolvable:$true] %s181_s29 }
  0x11   : > { %s941_s6 = sadd.s32 1, %s840_s23   ;;  %s53_s7 = sadd.s32 1, %s836_s22 }
  0x12   : > { %s1137_s27 = scalar_select %p925_p9, 1, 0 }
  0x13   : > { %p611_p10 = pneg %p925_p9  ;;  %s50_s8 = ssub.s32 %s840_s23, %s941_s6 }
  0x14   : > { %s682_s11 = scalar_lea.hbm %s1128_s2, 512 }
  0x15   : > { %p936_p12 = pnand %p611_p10, %p1132_p1  ;;  %p683_p13 = scmp.ne.s32.totalorder %s1128_s2, %s682_s11 }
  0x16   : > { %p689_p7 = scmp.lt.u32.totalorder %s682_s11, %s1128_s2 }
  0x17   : > { %p684_p0 = pneg %p936_p12 }
  0x19   : > { %p685_p3 = pnand %p684_p0, %p683_p13 }
  0x1b   : > { %p686_p5 = pneg %p685_p3 }
  0x1d   : > { %p691_p10 = pnand %p689_p7, %p686_p5 }
  0x1f   : > { %694 = shalt.err (!%p691_p10)
}
  0x20   : > { %s695_s16 = scalar_lea.vmem %s929_s29, 512  ;;  %p703_p2 = scmp.lt.s32.totalorder %s929_s29, %s929_s29 }
  0x21   : > { %p696_p11 = scmp.ne.s32.totalorder %s929_s29, %s695_s16  ;;  %p704_p6 = scmp.lt.s32.totalorder %s695_s16, %s695_s16 }
  0x23   : > { %p698_p8 = pnand %p696_p11, %p684_p0  ;;  %p705_p4 = por %p704_p6, %p703_p2 }
  0x25   : > { %p699_p1 = pneg %p698_p8 }
  0x27   : > { %p706_p9 = pnand %p705_p4, %p699_p1 }
  0x29   : > { %709 = shalt.err (!%p706_p9)
}
  0x2a   : > { %s843_s17 = smov 128   ;;  %s844_s18 = smov 8  }
  0x2b   : > { %614 = dma.hbm_to_vmem [thread:$0]  (!%p936_p12), %s1128_s2, 512, %s929_s29, [#allocation8], %s843_s17, %s843_s17, %s844_s18  }
  0x2c   : > { %p51_p1 = scmp.eq.s32.totalorder %s50_s8, 0  ;;  %p60_p2 = scmp.ne.s32.totalorder %s836_s22, %s832_s21 }
  0x2d   : > { %p61_p4 = scmp.eq.s32.totalorder %s840_s23, 0  ;;  %p624_p6 = scmp.lt.s32.totalorder %s840_s23, 2 }
  0x2e   : > { %s975_s28 = scalar_select %p51_p1, %s836_s22, %s53_s7  }
  0x2f   : > { %p62_p8 = por %p61_p4, %p60_p2  ;;  %p1139_p9 = scmp.eq.s32.totalorder %s905_s0, 1 }
  0x30   : > { %s198_s30 = sand.u32 1, %s836_s22   ;;  %s572_s10 = sshll.u32 %s840_s23, 8 }
  0x31   : > { %p979_p11 = por %p1139_p9, %p60_p2  ;;  %s552_s11 = sshll.u32 %s198_s30, 4 }
  0x32   : > { %s988_s14 = scalar_lea.hbm %s1127_s1, %s572_s10  ;;  %s202_s29 = scalar_lea.vmem [#allocation4], %s552_s11 }
  0x33   : > { %s209_s7 = sshll.u32 %s202_s29, 4  ;;  %p990_p12 = pnand %p624_p6, %p62_p8  ;;  %s994_s7 = int_to_ptr.vmem [resolvable:$true] %s209_s7 }
  0x34   : > { %s996_s15 = scalar_lea.sflag [#allocation5], %s198_s30  ;;  %s710_s16 = scalar_lea.hbm %s988_s14, 256 }
  0x35   : > { %p711_p13 = scmp.ne.s32.totalorder %s988_s14, %s710_s16  ;;  %p712_p0 = pneg %p990_p12 }
  0x36   : > { %s715_s10 = scalar_lea.hbm %s1127_s1, 512  ;;  %p716_p7 = scmp.lt.u32.totalorder %s988_s14, %s1127_s1 }
  0x37   : > { %p713_p3 = pnand %p712_p0, %p711_p13  ;;  %p717_p10 = scmp.lt.u32.totalorder %s715_s10, %s710_s16 }
  0x38   : > { %p719_p2 = scmp.lt.u32.totalorder %s710_s16, %s988_s14 }
  0x39   : > { %p714_p5 = pneg %p713_p3  ;;  %p718_p1 = por %p717_p10, %p716_p7 }
  0x3b   : > { %p720_p4 = por %p719_p2, %p718_p1 }
  0x3d   : > { %p721_p6 = pnand %p720_p4, %p714_p5 }
  0x3f   : > { %724 = shalt.err (!%p721_p6)
}
  0x40   : > { %s725_s30 = scalar_lea.vmem %s994_s7, 256  ;;  %s845_s13 = smov [#allocation4]  }
  0x41   : > { %p726_p8 = scmp.ne.s32.totalorder %s994_s7, %s725_s30  ;;  %s730_s29 = sshll.u32 %s845_s13, 4  ;;  %s731_s29 = int_to_ptr.vmem [resolvable:$false] %s730_s29 }
  0x42   : > { %s732_s19 = scalar_lea.vmem %s731_s29, 512  ;;  %p733_p3 = scmp.lt.s32.totalorder %s994_s7, %s731_s29 }
  0x43   : > { %p728_p9 = pnand %p726_p8, %p712_p0  ;;  %p734_p7 = scmp.lt.s32.totalorder %s732_s19, %s725_s30 }
  0x45   : > { %p729_p13 = pneg %p728_p9  ;;  %p735_p10 = por %p734_p7, %p733_p3 }
  0x47   : > { %p736_p1 = pnand %p735_p10, %p729_p13 }
  0x49   : > { %739 = shalt.err (!%p736_p1)
}
  0x4a   : > { %618 = dma.hbm_to_vmem [thread:$0]  (!%p990_p12), %s988_s14, 256, %s994_s7, %s996_s15, %s843_s17, %s843_s17, %s844_s18  }
  0x4b   : > { %p1142_p0 = scmp.ne.s32.totalorder %s1137_s27, 0 }
  0x4c   : > { %s1030_s16 = sand.u32 (!%p1142_p0), 1, %s832_s21   ;;  %p1143_p5 = scmp.ne.s32.totalorder (!%p1142_p0), %s1135_s25, 0 }
  0x4d   : > { %221 = sbr.rel (%p1142_p0) target bundleno = 611 (0x263), region = 36  ;;  %s556_s24 = sshll.u32 (!%p1142_p0), %s1030_s16, 4 }
  0x4e   : > { %s224_s10 = scalar_lea.sflag (!%p1142_p0), [#allocation5], %s1030_s16  ;;  %s227_s11 = scalar_lea.vmem (!%p1142_p0), [#allocation4], %s556_s24 }
  0x54   : > { %811 = dma.done.wait (%p1143_p5), %s224_s10, 256  }
  0x55   : > { %813 = vsyncadd (%p1143_p5), %s224_s10, 4294967040  ;;  %p1144_p2 = scmp.eq.s32.totalorder %s905_s0, 0 }
  0x57   : > { %815 = dma.done.wait (%p1144_p2), [#allocation8], 512   ;;  %p1145_p12 = pmov %p1144_p2 }
  0x58   : > { %s1042_s27 = scalar_lea.vmem [#allocation9], %s556_s24  ;;  %p1146_p4 = scmp.ne.s32.totalorder %s905_s0, 0 }
  0x59   : > { %817 = vsyncadd (%p1145_p12), [#allocation8], 4294966784  ;;  %v846_v0 = vmov (!%p1146_p4), 0.0  }
  0x5a   : > { %263 = sbr.rel (%p1146_p4) target bundleno = 97 (0x61), region = 48  ;;  %264 = vst [vmem:[#allocation2] sm:$0x1] (!%p1146_p4), %v846_v0 }
  0x61 PF: > { %v267_v1 = vld [vmem:[#allocation7] sm:$0xff]  ;;  %v268_v2 = vld [vmem:[#allocation7 + $0x8] sm:$0xff]  ;;  %v269_v3 = vld [vmem:[#allocation7 + $0x10] sm:$0xff]  ;;  %vm278_vm0 = vcmask 261120   ;;  %s364_s18 = sld [smem:[#allocation3]]  ;;  %v365_v18 = vlaneseq  ;;  %s563_s14 = sshll.u32 %s905_s0, 4 }
  0x62   : > { %v591_v4 = vpack.c.bf16 %v268_v2, %v267_v1  ;;  %v270_v5 = vld [vmem:[#allocation7 + $0x18] sm:$0xff]  ;;  %v265_v6 = vld [vmem:[%s227_s11] sm:$0xff]  ;;  %v369_v27 = vstv %s563_s14  ;;  %p564_p6 = scmp.ne.s32.totalorder %s905_s0, 1 }
  0x63   : > { %v595_v7 = vpack.c.bf16 %v270_v5, %v269_v3  ;;  %588 = vmatprep.mubr.msk.f32.mxu0 %vm278_vm0, %v265_v6  ;;  %v266_v8 = vld [vmem:[%s227_s11 + $0x8] sm:$0xff]  ;;  %v366_v19 = vshrl.u32 %v365_v18, 7  ;;  %v373_v32 = vand.u32 127, %v365_v18  ;;  %vm413_vm10 = vcmask (!%p564_p6), 1040384  }
  0x64   : > { %592 = vmatprep.subr.bf16.mxu0 %v591_v4  ;;  %v560_v9 = vld [vmem:[%s1129_s3] ss:$0 sm:$0xff]  ;;  %vm427_vm11 = vcmask (!%p564_p6), 0  }
  0x65   : > { %594 = vmatpush3.bf16.msra.mxu0 %v591_v4  ;;  %v367_v25 = vadd.s32 8, %v366_v19  ;;  %v370_v33 = vadd.s32 %v369_v27, %v366_v19  ;;  %vm376_vm2 = vcmp.lt.s32.totalorder %v373_v32, 1  ;;  %v398_v44 = vld [vmem:[#allocation2] sm:$0x1] }
  0x66   : > { %596 = vmatprep.subr.bf16.mxu0 %v595_v7 }
  0x67   : > { %v389_v21 = vstv %s364_s18  ;;  %v371_v31 = vadd.s32 %v369_v27, %v367_v25  ;;  %vm374_vm3 = vcmp.lt.s32.totalorder %v370_v33, 20 }
  0x68   : > { %vm377_vm6 = vmand %vm374_vm3, %vm376_vm2 }
  0x69   : > { %598 = vmatpush3.bf16.msra.mxu0 %v595_v7  ;;  %vm375_vm1 = vcmp.lt.s32.totalorder %v371_v31, 20 }
  0x6a   : > { %vm378_vm4 = vmand %vm375_vm1, %vm376_vm2 }
  0x6c   : > { %589 = vmatmul.mubr.msk.f32.vlgmr.msra.gmra.mrb[0].mxu0 %vm278_vm0, %v266_v8 }
 0x13f   : > { %v590_v10 = vpop.f32.mrb[0].mxu0 }
 0x140   : > { %v357_v11 = vadd.f32 %v590_v10, %v560_v9  ;;  %v351_v12 = vpop.f32.mrb[1].mxu0 }
 0x141   : > { %v352_v13 = vadd.f32 %v560_v9, %v351_v12 }
 0x142   : > { %v361_v14 = vand.u32 2147483647, %v357_v11 }
 0x143   : > { %v360_v15 = vand.u32 2147483647, %v352_v13 }
 0x144   : > { %363 = vst [vmem:[%s1042_s27 + $0x8] sm:$0xff] %v361_v14  ;;  %v384_v16 = vmax.f32 %v361_v14, 1e-30  ;;  %vm380_vm5 = vcmp.gt.f32.partialorder %v361_v14, 0.0 }
 0x145   : > { %362 = vst [vmem:[%s1042_s27] sm:$0xff] %v360_v15  ;;  %v383_v17 = vmax.f32 %v360_v15, 1e-30  ;;  %vm379_vm7 = vcmp.gt.f32.partialorder %v360_v15, 0.0  ;;  %vm382_vm8 = vmand %vm378_vm4, %vm380_vm5 }
 0x146   : > { %668 = vlog2.f32 %v384_v16  ;;  %vm381_vm9 = vmand %vm377_vm6, %vm379_vm7 }
 0x147   : > { %670 = vlog2.f32 %v383_v17 }
 0x150   : > { %v669_v20 = vpop.eup %668 }
 0x151   : > { %v671_v22 = vpop.eup %670  ;;  %v388_v23 = vmul.f32 0.6931472, %v669_v20 }
 0x152   : > { %v386_v24 = vmul.f32 0.6931472, %v671_v22 }
 0x153   : > { %v391_v26 = vmul.f32 %v389_v21, %v388_v23 }
 0x154   : > { %v390_v28 = vmul.f32 %v389_v21, %v386_v24 }
 0x155   : > { %v394_v29 = vmul.f32 1.442695, %v391_v26 }
 0x156   : > { %v392_v30 = vmul.f32 1.442695, %v390_v28 }
 0x157   : > { %672 = vpow2.f32 %v394_v29 }
 0x158   : > { %674 = vpow2.f32 %v392_v30 }
 0x159   : > { %676 = vrcp.f32 (!%p564_p6), %v389_v21 }
 0x161   : > { %v673_v34 = vpop.eup %672 }
 0x162   : > { %v675_v35 = vpop.eup %674  ;;  %v397_v36 = vsel %vm382_vm8, %v673_v34, 0.0 }
 0x163   : > { %v396_v37 = vsel %vm381_vm9, %v675_v35, 0.0  ;;  %v677_v52 = vpop.eup (!%p564_p6), %676 }
 0x164   : > { %v399_v38 = vadd.f32 %v397_v36, %v396_v37 }
 0x166   : > { %v400_v39 = vrot.slane %v399_v38, 4 }
 0x168   : > { %v401_v40 = vadd.f32 %v400_v39, %v399_v38 }
 0x16a   : > { %v402_v41 = vrot.slane %v401_v40, 2 }
 0x16c   : > { %v403_v42 = vadd.f32 %v402_v41, %v401_v40 }
 0x16e   : > { %v404_v43 = vrot.slane %v403_v42, 1  ;;  %411 = sbr.rel (%p564_p6) target bundleno = 557 (0x22d), region = 52 }
 0x170   : > { %v405_v45 = vadd.f32 %v404_v43, %v403_v42 }
 0x172   : > { %v406_v46 = vadd.f32 %v405_v45, %v398_v44 }
 0x174   : > { %407 = vst [vmem:[#allocation2] sm:$0x1] %v406_v46 }
 0x17b   : > { %v412_v47 = vld [vmem:[#allocation2] sm:$0x1] }
 0x17c   : > { %v414_v48 = vsel %vm413_vm10, %v412_v47, 0.0 }
 0x17d   : > { %415 = vadd.xlane.f32.xlu0 %v414_v48 }
 0x20a   : > { %v416_v49 = vpop.xlane.xlu0 %415 }
 0x20b   : > { %v417_v50 = vmul.f32 0.05, %v416_v49 }
 0x20d   : > { %v419_v51 = vmax.f32 %v417_v50, 1e-30  ;;  %vm418_vm12 = vcmp.gt.f32.partialorder %v417_v50, 0.0 }
 0x20f   : > { %678 = vlog2.f32 %v419_v51 }
 0x219   : > { %v679_v53 = vpop.eup %678 }
 0x21a   : > { %v421_v54 = vmul.f32 0.6931472, %v679_v53 }
 0x21c   : > { %v423_v55 = vmul.f32 %v677_v52, %v421_v54 }
 0x21e   : > { %v424_v56 = vmul.f32 1.442695, %v423_v55 }
 0x220   : > { %680 = vpow2.f32 %v424_v56 }
 0x22a   : > { %v681_v57 = vpop.eup %680 }
 0x22b   : > { %v426_v58 = vsel %vm418_vm12, %v681_v57, 0.0 }
 0x22c   : > { %428 = vst.msk [vmem:[#allocation10] sm:$0x1] %vm427_vm11, %v426_v58 }
 0x22d PF: > { %s573_s7 = sshll.u32 %s905_s0, 8  ;;  %s443_s30 = sshll.u32 %s1042_s27, 4  ;;  %s1060_s30 = int_to_ptr.vmem [resolvable:$true] %s443_s30 }
 0x22e   : > { %s1057_s12 = scalar_lea.hbm %s1130_s4, %s573_s7  ;;  %s430_s13 = scalar_lea.sflag [#allocation6], %s1030_s16 }
 0x22f   : > { %s740_s29 = scalar_lea.vmem %s1060_s30, 256  ;;  %s847_s19 = smov [#allocation9]  }
 0x230   : > { %p741_p8 = scmp.ne.s32.totalorder %s1060_s30, %s740_s29  ;;  %s744_s24 = sshll.u32 %s847_s19, 4  ;;  %s745_s24 = int_to_ptr.vmem [resolvable:$false] %s744_s24 }
 0x231   : > { %s746_s10 = scalar_lea.vmem %s745_s24, 512  ;;  %p747_p3 = scmp.lt.s32.totalorder %s1060_s30, %s745_s24 }
 0x232   : > { %p742_p9 = pnand %p741_p8, %p979_p11  ;;  %p748_p7 = scmp.lt.s32.totalorder %s746_s10, %s740_s29 }
 0x234   : > { %p743_p13 = pneg %p742_p9  ;;  %p749_p10 = por %p748_p7, %p747_p3 }
 0x236   : > { %p750_p1 = pnand %p749_p10, %p743_p13 }
 0x238   : > { %753 = shalt.err (!%p750_p1)
}
 0x239   : > { %s754_s11 = scalar_lea.hbm %s1057_s12, 256  ;;  %s758_s17 = scalar_lea.hbm %s1130_s4, 512 }
 0x23a   : > { %p755_p0 = scmp.ne.s32.totalorder %s1057_s12, %s754_s11  ;;  %p759_p12 = scmp.lt.u32.totalorder %s1057_s12, %s1130_s4 }
 0x23b   : > { %p760_p4 = scmp.lt.u32.totalorder %s758_s17, %s754_s11  ;;  %p762_p8 = scmp.lt.u32.totalorder %s754_s11, %s1057_s12 }
 0x23c   : > { %p756_p5 = pnand %p755_p0, %p979_p11 }
 0x23d   : > { %p761_p6 = por %p760_p4, %p759_p12 }
 0x23e   : > { %p757_p2 = pneg %p756_p5 }
 0x23f   : > { %p763_p9 = por %p762_p8, %p761_p6 }
 0x241   : > { %p764_p13 = pnand %p763_p9, %p757_p2 }
 0x243   : > { %767 = shalt.err (!%p764_p13)
}
 0x244   : > { %s848_s7 = smov 128   ;;  %s849_s8 = smov 8  }
 0x245   : > { %605 = dma.vmem_to_hbm [thread:$0]  (%p979_p11), %s1060_s30, 256, %s1057_s12, %s430_s13, %s848_s7, %s848_s7, %s849_s8  }
 0x246   : > { %s850_s15 = smov [#allocation10]   ;;  %p1147_p7 = scmp.eq.s32.totalorder %s905_s0, 1 }
 0x247   : > { %s457_s29 = sshll.u32 %s850_s15, 4  ;;  %s458_s29 = int_to_ptr.vmem [resolvable:$true] %s457_s29 }
 0x248   : > { %s768_s19 = scalar_lea.vmem %s458_s29, 16  ;;  %s774_s24 = scalar_lea.vmem %s458_s29, 32 }
 0x249   : > { %p769_p3 = scmp.ne.s32.totalorder %s458_s29, %s768_s19  ;;  %p775_p0 = scmp.lt.s32.totalorder %s458_s29, %s458_s29 }
 0x24a   : > { %p776_p5 = scmp.lt.s32.totalorder %s774_s24, %s768_s19 }
 0x24b   : > { %p770_p10 = pnand %p769_p3, %p1147_p7 }
 0x24c   : > { %p777_p2 = por %p776_p5, %p775_p0 }
 0x24d   : > { %p771_p1 = pneg %p770_p10 }
 0x24f   : > { %p778_p12 = pnand %p777_p2, %p771_p1 }
 0x251   : > { %781 = shalt.err (!%p778_p12)
}
 0x252   : > { %s782_s9 = scalar_lea.hbm %s1131_s5, 16  ;;  %p1148_p4 = pmov %p1147_p7 }
 0x253   : > { %p783_p11 = scmp.ne.s32.totalorder %s1131_s5, %s782_s9  ;;  %p788_p9 = scmp.lt.u32.totalorder %s782_s9, %s1131_s5 }
 0x255   : > { %p784_p6 = pnand %p783_p11, %p1148_p4 }
 0x257   : > { %p785_p8 = pneg %p784_p6 }
 0x259   : > { %p790_p13 = pnand %p788_p9, %p785_p8 }
 0x25b   : > { %793 = shalt.err (!%p790_p13)
}
 0x25c   : > { %p1149_p3 = pmov %p1148_p4 }
 0x25e   : > { %607 = dma.vmem_to_hbm [thread:$0]  (%p1149_p3), %s458_s29, 16, %s1131_s5, [#allocation11]  }
 0x25f   : > { %p1150_p7 = pmov %p1149_p3 }
 0x260   : > { %p1151_p10 = pmov %p1149_p3 }
 0x261   : > { %819 = dma.done.wait (%p1150_p7), [#allocation11], 16  }
 0x262   : > { %821 = vsyncadd (%p1151_p10), [#allocation11], 4294967280 }
 0x263 PF: > { %s473_s17 = sand.u32 1, %s828_s20   ;;  %p1152_p1 = scmp.ne.s32.totalorder %s1136_s26, 0 }
 0x264   : > { %p1153_p0 = scmp.ge.s32.totalorder %s840_s23, 2  ;;  %s474_s18 = scalar_lea.sflag [#allocation6], %s473_s17 }
 0x266   : > { %p620_p5 = pnand %p1153_p0, %p1152_p1 }
 0x268   : > { %823 = dma.done.wait (!%p620_p5), %s474_s18, 256  }
 0x269   : > { %825 = vsyncadd (!%p620_p5), %s474_s18, 4294967040  ;;  %p22_p2 = scmp.ge.s32.totalorder %s941_s6, 4   ;;  %s1154_s20 = smov %s832_s21 }
 0x26a   : > { %s1155_s21 = smov %s836_s22  ;;  %s1156_s22 = smov %s975_s28 }
 0x26b   : > { %s1157_s23 = smov %s941_s6  ;;  %24 = sbr.rel (!%p22_p2) target bundleno = 9 (0x9), region = 101 }
 0x272   :  { %479 = vsyncpa [#allocation5], 1 }
 0x273   :  { %481 = vsyncpa [#allocation5 + $0x1], 1 }
 0x274   :  { %482 = vsyncpa [#allocation8], 1 }
 0x275   :  { %483 = vsyncpa [#allocation6], 1 }
 0x276   :  { %485 = vsyncpa [#allocation6 + $0x1], 1 }
 0x277   :  { %486 = vsyncpa [#allocation11], 1 }

</bundles_post_ra>
